<compile_context>
chip_gen: v6e
topology: v6e:2x2x1
jax: 0.10.0
libtpu: 0.0.40
codegen_flags: <defaults>
</compile_context>

<pallas_src>
import jax
import jax.numpy as jnp
from jax.experimental import pallas as pl
from jax.experimental.pallas import tpu as pltpu


def autopad(k, p=None):
    if p is None:
        p = k // 2 if isinstance(k, int) else [x // 2 for x in k]
    return p


def _round_up(x, m):
    return (x + m - 1) // m * m


def _tile_bytes(major, sub, lane, itemsize):
    """Worst-case VMEM footprint of a (major, sub, lane) block with (8,128) tiling."""
    return major * _round_up(max(sub, 1), 8) * _round_up(max(lane, 1), 128) * itemsize


# Conservative per-step budget: fits v5e's 16 MiB default scoped VMEM with
# headroom; vmem_limit_bytes below gives extra slack on v6e/v7x.
_VMEM_TILE_BUDGET = 10 * 1024 * 1024


def _pick_tile_h(H_out, *, N, W_pad, W_out, C1, C2p, k, s, fuse_taps,
                 in_itemsize, out_itemsize, cd_itemsize, tile_h):
    # tile_h*s >= k - s so the halo fits entirely inside the next input block.
    min_th = max(1, -(-max(k - s, 0) // s))
    if tile_h is not None:
        if H_out % tile_h != 0 or tile_h < min_th:
            raise ValueError(
                f"tile_h={tile_h} must divide H_out={H_out} and be >= {min_th}")
        return tile_h

    halo = max(k - s, 0)

    def vmem_estimate(tH):
        b = 2 * _tile_bytes(tH * s, W_pad, C1, in_itemsize)       # x slab (dbl buf)
        b += 2 * _tile_bytes(halo, W_pad, C1, in_itemsize)        # halo (dbl buf)
        b += 2 * _tile_bytes(tH, W_out, C2p, out_itemsize)        # out slab (dbl buf)
        b += _tile_bytes(tH, W_out, C2p, 4)                       # f32 accumulator
        if fuse_taps:
            b += _tile_bytes(tH, W_out, k * k * C1, cd_itemsize)  # im2col temp
        b += _tile_bytes(k * k, C1, C2p, cd_itemsize)             # resident weights
        return b

    divisors = [d for d in range(H_out, 0, -1) if H_out % d == 0 and d >= min_th]
    if not divisors:
        raise NotImplementedError(
            "output height is smaller than the halo tile this kernel needs")
    # Prefer tiles that (a) fit the VMEM budget and (b) leave >= 2 grid steps so
    # both v7x TensorCores have work even at batch 1.
    for d in divisors:
        if vmem_estimate(d) <= _VMEM_TILE_BUDGET and N * (H_out // d) >= 2:
            return d
    for d in divisors:
        if vmem_estimate(d) <= _VMEM_TILE_BUDGET:
            return d
    return divisors[-1]   # smallest valid tile; correctness over perf


def _make_kernel(*, k, s, tH, W_pad, W_out, C1, C2p, halo_rows, fuse_taps,
                 act, compute_dtype):
    tH_in = (tH - 1) * s + k

    def compute(xv, w_ref, b_ref, o_ref):
        # xv: (tH_in, W_pad, C1) slab of zero-padded input rows (input dtype).
        taps = []
        for kh in range(k):
            for kw in range(k):
                if s == 1:
                    patch = jax.lax.slice(
                        xv, (kh, kw, 0), (kh + tH, kw + W_out, C1))
                else:
                    # TODO(synk): stride-1 phase decomposition instead of a
                    # strided slice (XLU gathers) for downsample layers.
                    patch = jax.lax.slice(
                        xv, (kh, kw, 0),
                        (kh + (tH - 1) * s + 1, kw + (W_out - 1) * s + 1, C1),
                        (s, s, 1))
                taps.append(patch)

        if fuse_taps:
            # im2col inside VMEM: single MXU contraction with K = k*k*C1.
            pat = taps[0] if len(taps) == 1 else jnp.concatenate(taps, axis=-1)
            pat = pat.reshape(tH * W_out, k * k * C1).astype(compute_dtype)
            acc = jnp.dot(pat, w_ref[...], preferred_element_type=jnp.float32)
        else:
            acc = jnp.zeros((tH * W_out, C2p), jnp.float32)
            for t, patch in enumerate(taps):
                acc += jnp.dot(
                    patch.reshape(tH * W_out, C1).astype(compute_dtype),
                    w_ref[t], preferred_element_type=jnp.float32)

        y = acc + b_ref[...]                 # BatchNorm (scale already folded into w)
        if act:
            y = y * jax.nn.sigmoid(y)        # SiLU (EUP)
        o_ref[...] = y.reshape(1, tH, W_out, C2p).astype(o_ref.dtype)

    if halo_rows > 0:
        def kernel(x_ref, h_ref, w_ref, b_ref, o_ref):
            xv = jnp.concatenate([x_ref[0], h_ref[0]], axis=0)   # (tH_in, W_pad, C1)
            compute(xv, w_ref, b_ref, o_ref)
    else:
        def kernel(x_ref, w_ref, b_ref, o_ref):
            xv = x_ref[0]
            if tH_in < tH * s:               # k < s: trim unused trailing rows
                xv = jax.lax.slice(xv, (0, 0, 0), (tH_in, W_pad, C1))
            compute(xv, w_ref, b_ref, o_ref)

    return kernel


def conv_bn_silu(x, w_hwio, gamma, beta, running_mean, running_var, *,
                 k=1, s=1, p=None, eps=1e-5, act=True, tile_h=None,
                 compute_dtype=jnp.bfloat16,
                 vmem_limit_bytes=32 * 1024 * 1024):
    """Pallas TPU port of models.common.Conv.forward (eval-mode BatchNorm).

    x: (N, C1, H, W) NCHW;  w_hwio: (k, k, C1, C2)  ->  (N, C2, H_out, W_out).
    Only scalar k, groups=1, dilation=1, act in {True (SiLU), False} supported.
    """
    N, C1, H, W = x.shape
    C2 = w_hwio.shape[-1]
    assert w_hwio.shape == (k, k, C1, C2), w_hwio.shape
    p = autopad(k, p)
    H_out = (H + 2 * p - k) // s + 1
    W_out = (W + 2 * p - k) // s + 1

    # ---- Fold BatchNorm (running stats) into the conv weights + a bias ------
    scale = (gamma / jnp.sqrt(running_var + eps)).astype(jnp.float32)
    bias = beta.astype(jnp.float32) - running_mean.astype(jnp.float32) * scale
    w_f32 = w_hwio.astype(jnp.float32) * scale[None, None, None, :]

    # ---- Lane-dense output channels: pad C2 up to a multiple of 128 ---------
    C2p = _round_up(C2, 128)
    if C2p != C2:
        w_f32 = jnp.pad(w_f32, ((0, 0), (0, 0), (0, 0), (0, C2p - C2)))
        bias = jnp.pad(bias, (0, C2p - C2))
    bias = bias.reshape(1, C2p)

    # im2col tap fusion only while the fused K dim (and its VMEM temp) is small.
    fuse_taps = (k * k * C1) <= 1024
    if fuse_taps:
        w_kern = w_f32.reshape(k * k * C1, C2p).astype(compute_dtype)
    else:
        w_kern = w_f32.reshape(k * k, C1, C2p).astype(compute_dtype)

    # ---- NCHW -> NHWC + spatial zero pad (one fused XLA copy) ---------------
    # TODO(synk): keep activations NHWC end-to-end and pad inside the kernel.
    x_nhwc = jnp.transpose(x, (0, 2, 3, 1))
    x_pad = jnp.pad(x_nhwc, ((0, 0), (p, p), (p, p), (0, 0)))
    H_pad, W_pad = H + 2 * p, W + 2 * p

    # ---- Spatial (H_out) tiling ---------------------------------------------
    tH = _pick_tile_h(H_out, N=N, W_pad=W_pad, W_out=W_out, C1=C1, C2p=C2p,
                      k=k, s=s, fuse_taps=fuse_taps,
                      in_itemsize=x.dtype.itemsize,
                      out_itemsize=x.dtype.itemsize,
                      cd_itemsize=jnp.dtype(compute_dtype).itemsize,
                      tile_h=tile_h)
    nH = H_out // tH
    halo_rows = max(k - s, 0)

    inputs = [x_pad]
    in_specs = [pl.BlockSpec((1, tH * s, W_pad, C1), lambda n, j: (n, j, 0, 0))]

    if halo_rows > 0:
        # halo[n*nH + j] = padded-input rows [(j+1)*tH*s, (j+1)*tH*s + halo_rows)
        need = nH * tH * s
        tail = x_pad[:, tH * s: tH * s + need, :, :]
        if tail.shape[1] < need:
            tail = jnp.pad(
                tail, ((0, 0), (0, need - tail.shape[1]), (0, 0), (0, 0)))
        halo = tail.reshape(N, nH, tH * s, W_pad, C1)[:, :, :halo_rows]
        halo = halo.reshape(N * nH, halo_rows, W_pad, C1)
        inputs.append(halo)
        in_specs.append(
            pl.BlockSpec((1, halo_rows, W_pad, C1),
                         lambda n, j: (n * nH + j, 0, 0, 0)))

    # Resident operands (constant index_map -> fetched once, kept in VMEM).
    w_ndim = w_kern.ndim
    inputs += [w_kern, bias]
    in_specs += [
        pl.BlockSpec(w_kern.shape, lambda n, j: (0,) * w_ndim),
        pl.BlockSpec((1, C2p), lambda n, j: (0, 0)),
    ]

    kernel = _make_kernel(k=k, s=s, tH=tH, W_pad=W_pad, W_out=W_out, C1=C1,
                          C2p=C2p, halo_rows=halo_rows, fuse_taps=fuse_taps,
                          act=act, compute_dtype=compute_dtype)

    out_nhwc = pl.pallas_call(
        kernel,
        out_shape=jax.ShapeDtypeStruct((N, H_out, W_out, C2p), x.dtype),
        grid=(N, nH),
        in_specs=in_specs,
        out_specs=pl.BlockSpec((1, tH, W_out, C2p), lambda n, j: (n, j, 0, 0)),
        compiler_params=pltpu.CompilerParams(
            dimension_semantics=("parallel", "parallel"),
            vmem_limit_bytes=vmem_limit_bytes),
    )(*inputs)

    # glue: drop the C2 pad and go NHWC -> NCHW (fused into one XLA copy).
    return jnp.transpose(out_nhwc[..., :C2], (0, 3, 1, 2))


def conv_bn_silu_ref(x, w_hwio, gamma, beta, mean, var, *,
                     k=1, s=1, p=None, eps=1e-5, act=True):
    """Pure-JAX reference mirroring the PyTorch forward (eval-mode BN)."""
    p = autopad(k, p)
    w_oihw = jnp.transpose(w_hwio, (3, 2, 0, 1))
    y = jax.lax.conv_general_dilated(
        x, w_oihw, window_strides=(s, s), padding=[(p, p), (p, p)],
        dimension_numbers=("NCHW", "OIHW", "NCHW"),
        precision=jax.lax.Precision.HIGHEST)
    scale = gamma / jnp.sqrt(var + eps)
    bias = beta - mean * scale
    y = y * scale[None, :, None, None] + bias[None, :, None, None]
    if act:
        y = y * jax.nn.sigmoid(y)
    return y


if __name__ == "__main__":
    key = jax.random.PRNGKey(0)
    N, C1, H, W = 2, 4, 16, 16
    C2 = 32

    k1, k2, k3, k4, k5, k6, k7 = jax.random.split(key, 7)
    x = jax.random.normal(k1, (N, C1, H, W), dtype=jnp.float32)
    gamma = 1.0 + 0.1 * jax.random.normal(k3, (C2,), dtype=jnp.float32)
    beta = 0.1 * jax.random.normal(k4, (C2,), dtype=jnp.float32)
    running_mean = 0.1 * jax.random.normal(k5, (C2,), dtype=jnp.float32)
    running_var = 1.0 + 0.1 * jax.random.uniform(k6, (C2,), dtype=jnp.float32)

    # bf16 MXU operands vs. an f32 HIGHEST-precision reference -> a slightly
    # wider tolerance than the pure-f32 version needed.
    ATOL = RTOL = 3e-2

    # --- 3x3 / stride-1 Conv (typical YOLOv5 block), 2 H-tiles per image -----
    k_, s_ = 3, 1
    w3 = jax.random.normal(k2, (k_, k_, C1, C2), jnp.float32) / jnp.sqrt(k_ * k_ * C1)
    out = conv_bn_silu(x, w3, gamma, beta, running_mean, running_var,
                       k=k_, s=s_, tile_h=8)
    out = jax.block_until_ready(out)
    exp = conv_bn_silu_ref(x, w3, gamma, beta, running_mean, running_var,
                           k=k_, s=s_)
    assert out.shape == (N, C2, H, W), out.shape
    assert out.dtype == x.dtype
    assert jnp.allclose(out, exp, atol=ATOL, rtol=RTOL), \
        float(jnp.max(jnp.abs(out - exp)))

    # --- 1x1 / stride-1 Conv (pointwise path, no halo, heuristic tile size) --
    w1 = jax.random.normal(k7, (1, 1, C1, C2), jnp.float32) / jnp.sqrt(C1)
    out1 = conv_bn_silu(x, w1, gamma, beta, running_mean, running_var, k=1, s=1)
    out1 = jax.block_until_ready(out1)
    exp1 = conv_bn_silu_ref(x, w1, gamma, beta, running_mean, running_var,
                            k=1, s=1)
    assert out1.shape == (N, C2, H, W), out1.shape
    assert jnp.allclose(out1, exp1, atol=ATOL, rtol=RTOL), \
        float(jnp.max(jnp.abs(out1 - exp1)))

    print("KERNEL_OK")
</pallas_src>

<mosaic_0001>
module attributes {stable_mosaic.version = 11 : i64} {
  func.func @kernel(%arg0: i32, %arg1: i32, %arg2: memref<1x8x18x4xf32, #tpu.memory_space<vmem>>, %arg3: memref<1x2x18x4xf32, #tpu.memory_space<vmem>>, %arg4: memref<36x128xbf16, #tpu.memory_space<vmem>>, %arg5: memref<1x128xf32, #tpu.memory_space<vmem>>, %arg6: memref<1x8x16x128xf32, #tpu.memory_space<vmem>>) attributes {dimension_semantics = [#tpu.dimension_semantics<parallel>, #tpu.dimension_semantics<parallel>], iteration_bounds = array<i64: 2, 2>, scalar_prefetch = 0 : i64, scratch_operands = 0 : i64, tpu.core_type = #tpu.core_type<tc>, window_params = [{transform_indices = @transform_0, window_bounds = array<i64: 1, 8, 18, 4>}, {transform_indices = @transform_1, window_bounds = array<i64: 1, 2, 18, 4>}, {pipeline_mode = #tpu.pipeline_mode<synchronous>, transform_indices = @transform_2, window_bounds = array<i64: 36, 128>}, {pipeline_mode = #tpu.pipeline_mode<synchronous>, transform_indices = @transform_3, window_bounds = array<i64: 1, 128>}, {transform_indices = @transform_4, window_bounds = array<i64: 1, 8, 16, 128>}]} {
    %c0 = arith.constant 0 : index
    %c0_0 = arith.constant 0 : index
    %c0_1 = arith.constant 0 : index
    %c0_2 = arith.constant 0 : index
    %0 = vector.load %arg2[%c0, %c0_0, %c0_1, %c0_2] : memref<1x8x18x4xf32, #tpu.memory_space<vmem>>, vector<1x8x18x4xf32>
    %1 = vector.shape_cast %0 : vector<1x8x18x4xf32> to vector<8x18x4xf32>
    %c0_3 = arith.constant 0 : index
    %c0_4 = arith.constant 0 : index
    %c0_5 = arith.constant 0 : index
    %c0_6 = arith.constant 0 : index
    %2 = vector.load %arg3[%c0_3, %c0_4, %c0_5, %c0_6] : memref<1x2x18x4xf32, #tpu.memory_space<vmem>>, vector<1x2x18x4xf32>
    %3 = vector.shape_cast %2 : vector<1x2x18x4xf32> to vector<2x18x4xf32>
    %4 = tpu.concatenate %1, %3 in 0 : vector<8x18x4xf32>, vector<2x18x4xf32> -> vector<10x18x4xf32>
    %5 = vector.extract_strided_slice %4 {offsets = [0, 0, 0], sizes = [8, 16, 4], strides = [1, 1, 1]} : vector<10x18x4xf32> to vector<8x16x4xf32>
    %6 = vector.extract_strided_slice %4 {offsets = [0, 1, 0], sizes = [8, 16, 4], strides = [1, 1, 1]} : vector<10x18x4xf32> to vector<8x16x4xf32>
    %7 = vector.extract_strided_slice %4 {offsets = [0, 2, 0], sizes = [8, 16, 4], strides = [1, 1, 1]} : vector<10x18x4xf32> to vector<8x16x4xf32>
    %8 = vector.extract_strided_slice %4 {offsets = [1, 0, 0], sizes = [8, 16, 4], strides = [1, 1, 1]} : vector<10x18x4xf32> to vector<8x16x4xf32>
    %9 = vector.extract_strided_slice %4 {offsets = [1, 1, 0], sizes = [8, 16, 4], strides = [1, 1, 1]} : vector<10x18x4xf32> to vector<8x16x4xf32>
    %10 = vector.extract_strided_slice %4 {offsets = [1, 2, 0], sizes = [8, 16, 4], strides = [1, 1, 1]} : vector<10x18x4xf32> to vector<8x16x4xf32>
    %11 = vector.extract_strided_slice %4 {offsets = [2, 0, 0], sizes = [8, 16, 4], strides = [1, 1, 1]} : vector<10x18x4xf32> to vector<8x16x4xf32>
    %12 = vector.extract_strided_slice %4 {offsets = [2, 1, 0], sizes = [8, 16, 4], strides = [1, 1, 1]} : vector<10x18x4xf32> to vector<8x16x4xf32>
    %13 = vector.extract_strided_slice %4 {offsets = [2, 2, 0], sizes = [8, 16, 4], strides = [1, 1, 1]} : vector<10x18x4xf32> to vector<8x16x4xf32>
    %14 = tpu.concatenate %5, %6, %7, %8, %9, %10, %11, %12, %13 in 2 : vector<8x16x4xf32>, vector<8x16x4xf32>, vector<8x16x4xf32>, vector<8x16x4xf32>, vector<8x16x4xf32>, vector<8x16x4xf32>, vector<8x16x4xf32>, vector<8x16x4xf32>, vector<8x16x4xf32> -> vector<8x16x36xf32>
    %15 = vector.shape_cast %14 : vector<8x16x36xf32> to vector<128x36xf32>
    %16 = arith.truncf %15 : vector<128x36xf32> to vector<128x36xbf16>
    %c0_7 = arith.constant 0 : index
    %c0_8 = arith.constant 0 : index
    %17 = vector.load %arg4[%c0_7, %c0_8] : memref<36x128xbf16, #tpu.memory_space<vmem>>, vector<36x128xbf16>
    %cst = arith.constant dense<0.000000e+00> : vector<128x128xf32>
    %18 = tpu.matmul %16, %17, %cst {dimension_numbers = #tpu.dot_dimension_numbers<[1], [0], [0], [1], [0, 0, 1, 1], [], []>} : vector<128x36xbf16>, vector<36x128xbf16>, vector<128x128xf32> -> vector<128x128xf32>
    %c0_9 = arith.constant 0 : index
    %c0_10 = arith.constant 0 : index
    %19 = vector.load %arg5[%c0_9, %c0_10] : memref<1x128xf32, #tpu.memory_space<vmem>>, vector<1x128xf32>
    %20 = vector.broadcast %19 : vector<1x128xf32> to vector<128x128xf32>
    %21 = arith.addf %18, %20 : vector<128x128xf32>
    %22 = arith.negf %21 : vector<128x128xf32>
    %23 = math.exp %22 : vector<128x128xf32>
    %cst_11 = arith.constant 1.000000e+00 : f32
    %24 = vector.broadcast %cst_11 : f32 to vector<128x128xf32>
    %25 = arith.addf %24, %23 : vector<128x128xf32>
    %26 = arith.divf %24, %25 : vector<128x128xf32>
    %27 = arith.mulf %21, %26 : vector<128x128xf32>
    %28 = vector.shape_cast %27 : vector<128x128xf32> to vector<1x8x16x128xf32>
    %c0_12 = arith.constant 0 : index
    %c0_13 = arith.constant 0 : index
    %c0_14 = arith.constant 0 : index
    %c0_15 = arith.constant 0 : index
    %29 = vector.load %arg6[%c0_12, %c0_13, %c0_14, %c0_15] : memref<1x8x16x128xf32, #tpu.memory_space<vmem>>, vector<1x8x16x128xf32>
    tpu.vector_store %arg6[%c0_12, %c0_13, %c0_14, %c0_15], %28 {strides = array<i32>} : memref<1x8x16x128xf32, #tpu.memory_space<vmem>>, vector<1x8x16x128xf32>,
    return
  }
  func.func @transform_0(%arg0: i32, %arg1: i32) -> (i32, i32, i32, i32) {
    %c0_i32 = arith.constant 0 : i32
    %c0_i32_0 = arith.constant 0 : i32
    %c0_i32_1 = arith.constant 0 : i32
    return %arg0, %arg1, %c0_i32, %c0_i32_0 : i32, i32, i32, i32
  }
  func.func @transform_1(%arg0: i32, %arg1: i32) -> (i32, i32, i32, i32) {
    %c2_i32 = arith.constant 2 : i32
    %0 = arith.muli %arg0, %c2_i32 : i32
    %1 = arith.addi %0, %arg1 : i32
    %c0_i32 = arith.constant 0 : i32
    %c0_i32_0 = arith.constant 0 : i32
    %c0_i32_1 = arith.constant 0 : i32
    %c0_i32_2 = arith.constant 0 : i32
    return %1, %c0_i32, %c0_i32_0, %c0_i32_1 : i32, i32, i32, i32
  }
  func.func @transform_2(%arg0: i32, %arg1: i32) -> (i32, i32) {
    %c0_i32 = arith.constant 0 : i32
    %c0_i32_0 = arith.constant 0 : i32
    %c0_i32_1 = arith.constant 0 : i32
    return %c0_i32, %c0_i32_0 : i32, i32
  }
  func.func @transform_3(%arg0: i32, %arg1: i32) -> (i32, i32) {
    %c0_i32 = arith.constant 0 : i32
    %c0_i32_0 = arith.constant 0 : i32
    %c0_i32_1 = arith.constant 0 : i32
    return %c0_i32, %c0_i32_0 : i32, i32
  }
  func.func @transform_4(%arg0: i32, %arg1: i32) -> (i32, i32, i32, i32) {
    %c0_i32 = arith.constant 0 : i32
    %c0_i32_0 = arith.constant 0 : i32
    %c0_i32_1 = arith.constant 0 : i32
    return %arg0, %arg1, %c0_i32, %c0_i32_0 : i32, i32, i32, i32
  }
}

</mosaic_0001>

<bundles_post_ra>
// kernel: tpu_custom_call.1
= control target key start
LH: loop header
LB: loop body
LE: loop exit
PB: predicated region body
PF: predicated region fallthrough
CT: control target
= control target key end

     0   :  { %9 = vsyncpa [#allocation3], 0  ;;  %s2816_s0 = inlined_call_operand.vmem [shape: f32[2,18,18,4], index: 0, kind: input, shape index: {}]   ;;  %s2817_s1 = inlined_call_operand.vmem [shape: f32[4,2,18,4], index: 1, kind: input, shape index: {}]   ;;  %s2818_s2 = inlined_call_operand.vmem [shape: bf16[36,128], index: 2, kind: input, shape index: {}]   ;;  %s2819_s3 = inlined_call_operand.vmem [shape: f32[1,128], index: 3, kind: input, shape index: {}]   ;;  %s2820_s4 = inlined_call_operand.hbm [shape: f32[2,16,16,128], index: 4, kind: output, shape index: {}]  }
   0x1   :  { %11 = vsyncpa [#allocation3 + $0x1], 0  ;;  %s2063_s15 = smov 0   ;;  %s2065_s16 = smov 0  }
   0x2   :  { %s2067_s17 = smov 0   ;;  %s2069_s18 = smov 0  }
   0x3   :  { %s2071_s19 = smov 0   ;;  %s2073_s20 = smov 0  }
   0x4   :  { %s2075_s21 = smov 0   ;;  %s2077_s22 = smov 0  }
   0x5 LB: > { %s1375_s23 = sadd.s32 4294967295, %s2026_s22   ;;  %s1376_s24 = sadd.s32 4294967294, %s2026_s22   ;;  %s2026_s22 = sphi %s2077_s22, %s17_s22   ;;  %s2022_s21 = sphi %s2075_s21, %s2829_s21   ;;  %s2018_s20 = sphi %s2073_s20, %s2828_s20   ;;  %s2014_s19 = sphi %s2071_s19, %s2827_s19   ;;  %s2010_s18 = sphi %s2069_s18, %s2826_s18   ;;  %s2006_s17 = sphi %s2067_s17, %s2825_s17   ;;  %s2002_s16 = sphi %s2065_s16, %s2824_s16   ;;  %s1998_s15 = sphi %s2063_s15, %s2823_s15  }
   0x6   : > { %s26_s25 = sadd.s32 1, %s2018_s20  ;;  %s29_s26 = sadd.s32 1, %s2022_s21 }
   0x7   : > { %p27_p0 = scmp.ge.s32.totalorder %s26_s25, 2  ;;  %p148_p1 = scmp.ne.s32.totalorder %s2006_s17, %s2002_s16 }
   0x8   : > { %p149_p2 = scmp.eq.s32.totalorder %s1375_s23, 3  ;;  %p154_p5 = scmp.ne.s32.totalorder %s2002_s16, %s1998_s15 }
   0x9   : > { %s2831_s25 = smov (%p27_p0, %s26_s25), 0  ;;  %s2833_s26 = smov (!%p27_p0, %s29_s26), %s2022_s21 }
   0xa   : > { %s134_s27 = ssub.s32 %s2018_s20, %s2831_s25  ;;  %p2114_p3 = por %p149_p2, %p148_p1 }
   0xb   : > { %p31_p4 = scmp.ge.s32.totalorder %s2833_s26, 2  ;;  %p155_p6 = scmp.eq.s32.totalorder %s1376_s24, 3 }
   0xc   : > { %p1381_p7 = scmp.ge.s32.totalorder %s2026_s22, 1  ;;  %p215_p9 = scmp.lt.s32.totalorder %s2026_s22, 5 }
   0xd   : > { %s2835_s26 = smov (%p31_p4, %s2833_s26), 0  ;;  %p2123_p8 = por %p155_p6, %p154_p5 }
   0xe   : > { %s133_s30 = ssub.s32 %s2022_s21, %s2835_s26  ;;  %s138_s5 = sadd.s32 1, %s2006_s17 }
   0xf   : > { %s135_s6 = sor.u32 %s134_s27, %s133_s30  ;;  %p216_p10 = pnand %p1381_p7, %p215_p9 }
  0x10   : > { %p136_p11 = scmp.eq.s32.totalorder %s135_s6, 0  ;;  %s1383_s8 = sshll.u32 (!%p216_p10), %s2010_s18, 3 }
  0x11   : > { %219 = sbr.rel (%p216_p10) target bundleno = 531 (0x213), region = 36  ;;  %p264_p12 = scmp.lt.s32.totalorder (!%p216_p10), %s2014_s19, 1 }
  0x12   : > { %s2132_s7 = scalar_select %p136_p11, %s2006_s17, %s138_s5  }
  0x13   : > { %p266_p13 = scmp.lt.s32.totalorder (!%p216_p10), %s1383_s8, 17  ;;  %s2028_s27 = smov (!%p216_p10), 4  }
  0x14   : > { %s2029_s30 = smov (!%p216_p10), 8   ;;  %s2030_s5 = smov (!%p216_p10), 12  }
  0x15   : > { %s2031_s6 = smov (!%p216_p10), 16  }
  0x16   : > { %s265_s9 = scalar_select %p264_p12, %s2014_s19, 1  ;;  %vm344_vm0 = vcmask 1046528   ;;  %vm433_vm1 = vcmask 1045504   ;;  %vm1032_vm2 = vcmask 1041408   ;;  %vm836_vm3 = vcmask 31744  }
  0x17   : > { %s2837_s8 = smov (!%p266_p13, %s1383_s8), 17  ;;  %vm853_vm4 = vcmask 64512   ;;  %vm870_vm5 = vcmask 97280   ;;  %vm887_vm6 = vcmask 130048   ;;  %vm904_vm7 = vcmask 162816  }
  0x18   : > { %s1465_s10 = smul.u32 54, %s265_s9  ;;  %s2033_s9 = smov 24   ;;  %vm921_vm8 = vcmask 195584   ;;  %vm938_vm9 = vcmask 228352   ;;  %vm955_vm10 = vcmask 261120   ;;  %vm1007_vm11 = vcmask 293888  }
  0x19   : > { %s1464_s11 = smul.u32 3, %s2837_s8  ;;  %s2032_s8 = smov 20  }
  0x1b   : > { %s270_s12 = sadd.s32 %s1465_s10, %s1464_s11  ;;  %s2035_s10 = smov 32  }
  0x1c   : > { %s1384_s13 = sshll.u32 %s270_s12, 3  ;;  %s2034_s12 = smov 28  }
  0x1d   : > { %s2140_s24 = scalar_lea.vmem %s2816_s0, %s1384_s13  ;;  %s1385_s11 = sshll.u32 %s2014_s19, 1 }
  0x1e   : > { %v2143_v0 = vld [vmem:[%s2140_s24 + $0x18] sm:$0xff]  ;;  %v2146_v1 = vld [vmem:[%s2140_s24 + $0x20] sm:$0xff]  ;;  %v2149_v2 = vld [vmem:[%s2140_s24 + $0x28] sm:$0x3]  ;;  %s280_s13 = sadd.s32 %s2010_s18, %s1385_s11 }
  0x1f   : > { %v350_v3 = vrot.slane %v2143_v0, 1  ;;  %v351_v4 = vrot.slane %v2146_v1, 1  ;;  %v353_v5 = vrot.slane %v2149_v2, 1  ;;  %v2155_v6 = vld [vmem:[%s2140_s24] sm:$0xff]  ;;  %v2158_v7 = vld [vmem:[%s2140_s24 + $0x8] sm:$0xff]  ;;  %v2164_v11 = vld [vmem:[%s2140_s24 + $0x78] sm:$0xff]  ;;  %v1582_v63 = vpack.i.bf16 %v2146_v1, %v2143_v0 }
  0x20   : > { %v292_v8 = vld [vmem:[%s2140_s24 + $0x10] sm:$0x3]  ;;  %v345_v9 = vrot.slane %v2155_v6, 1  ;;  %v346_v10 = vrot.slane %v2158_v7, 1  ;;  %v2167_v12 = vld [vmem:[%s2140_s24 + $0x80] sm:$0xff]  ;;  %v442_v15 = vrot.slane %v2149_v2, 2 }
  0x21   : > { %v352_v13 = vsel %vm344_vm0, %v350_v3, %v351_v4  ;;  %v354_v14 = vsel %vm344_vm0, %v351_v4, %v353_v5  ;;  %v348_v16 = vrot.slane %v292_v8, 1  ;;  %v307_v17 = vld [vmem:[%s2140_s24 + $0x88] sm:$0x3]  ;;  %v2174_v18 = vld [vmem:[%s2140_s24 + $0x60] sm:$0xff]  ;;  %v437_v22 = vrot.slane %v292_v8, 2  ;;  %v2233_v61 = vld [vmem:[%s2140_s24 + $0x90] sm:$0xff] }
  0x22   : > { %v2177_v19 = vld [vmem:[%s2140_s24 + $0x68] sm:$0xff]  ;;  %v2179_v20 = vpack.i.bf16 %v354_v14, %v352_v13  ;;  %v347_v21 = vsel %vm344_vm0, %v345_v9, %v346_v10  ;;  %v370_v23 = vrot.slane %v2164_v11, 1  ;;  %v304_v24 = vld [vmem:[%s2140_s24 + $0x70] sm:$0x3]  ;;  %v371_v26 = vrot.slane %v2167_v12, 1  ;;  %v2236_v62 = vld [vmem:[%s2140_s24 + $0x98] sm:$0xff] }
  0x23   : > { %v349_v25 = vsel %vm344_vm0, %v346_v10, %v348_v16  ;;  %v373_v27 = vrot.slane %v307_v17, 1  ;;  %v365_v28 = vrot.slane %v2174_v18, 1  ;;  %v366_v30 = vrot.slane %v2177_v19, 1  ;;  %v310_v2 = vld [vmem:[%s2140_s24 + $0xa0] sm:$0x3]  ;;  %v2243_v3 = vld [vmem:[%s2140_s24 + $0x30] sm:$0xff] }
  0x24   : > { %1558 = vrot.lane.b32.xlu1 %v2179_v20, %s2028_s27  ;;  %v1547_v29 = vpack.i.bf16 %v349_v25, %v347_v21  ;;  %v368_v31 = vrot.slane %v304_v24, 1  ;;  %v454_v32 = vrot.slane %v2174_v18, 2  ;;  %v372_v33 = vsel %vm344_vm0, %v370_v23, %v371_v26  ;;  %v2246_v4 = vld [vmem:[%s2140_s24 + $0x38] sm:$0xff]  ;;  %v298_v8 = vld [vmem:[%s2140_s24 + $0x40] sm:$0x3]  ;;  %p281_p0 = scmp.lt.s32.totalorder %s280_s13, 3 }
  0x25   : > { %v374_v34 = vsel %vm344_vm0, %v371_v26, %v373_v27  ;;  %v455_v35 = vrot.slane %v2177_v19, 2  ;;  %v457_v36 = vrot.slane %v304_v24, 2  ;;  %v367_v38 = vsel %vm344_vm0, %v365_v28, %v366_v30 }
  0x26   : > { %1548 = vrot.lane.b32.xlu0 %v1547_v29, %s2028_s27  ;;  %v2195_v37 = vpack.i.bf16 %v374_v34, %v372_v33  ;;  %v369_v39 = vsel %vm344_vm0, %v366_v30, %v368_v31  ;;  %v434_v40 = vrot.slane %v2155_v6, 2  ;;  %v435_v44 = vrot.slane %v2158_v7, 2  ;;  %s2839_s13 = smov (!%p281_p0, %s280_s13), 3 }
  0x27   : > { %v2200_v41 = vpack.i.bf16 %v369_v39, %v367_v38  ;;  %v456_v42 = vsel %vm433_vm1, %v454_v32, %v455_v35  ;;  %v458_v43 = vsel %vm433_vm1, %v455_v35, %v457_v36  ;;  %v459_v46 = vrot.slane %v2164_v11, 2  ;;  %v2296_v39 = vld [vmem:[%s2140_s24 + $0xa8] sm:$0xff]  ;;  %s1466_s14 = smul.u32 48, %s2839_s13 }
  0x28   : > { %1563 = vrot.lane.b32.xlu1 %v2195_v37, %s2028_s27  ;;  %v2207_v45 = vpack.i.bf16 %v458_v43, %v456_v42  ;;  %v460_v47 = vrot.slane %v2167_v12, 2  ;;  %v462_v48 = vrot.slane %v307_v17, 2  ;;  %v436_v49 = vsel %vm433_vm1, %v434_v40, %v435_v44  ;;  %v2299_v40 = vld [vmem:[%s2140_s24 + $0xb0] sm:$0xff]  ;;  %v313_v42 = vld [vmem:[%s2140_s24 + $0xb8] sm:$0x3]  ;;  %v2305_v43 = vld [vmem:[%s2140_s24 + $0x48] sm:$0xff] }
  0x29   : > { %v438_v50 = vsel %vm433_vm1, %v435_v44, %v437_v22  ;;  %v439_v51 = vrot.slane %v2143_v0, 2  ;;  %v440_v52 = vrot.slane %v2146_v1, 2  ;;  %v2230_v60 = vpack.i.bf16 %v2167_v12, %v2164_v11  ;;  %v2308_v44 = vld [vmem:[%s2140_s24 + $0x50] sm:$0xff]  ;;  %s2377_s11 = scalar_lea.vmem %s2817_s1, %s1466_s14 }
  0x2a   : > { %1553 = vrot.lane.b32.xlu0 %v2200_v41, %s2028_s27  ;;  %v1567_v53 = vpack.i.bf16 %v438_v50, %v436_v49  ;;  %v461_v54 = vsel %vm433_vm1, %v459_v46, %v460_v47  ;;  %v463_v55 = vsel %vm433_vm1, %v460_v47, %v462_v48  ;;  %v1602_v5 = vpack.i.bf16 %v2236_v62, %v2233_v61  ;;  %v301_v47 = vld [vmem:[%s2140_s24 + $0x58] sm:$0x3] }
  0x2b   : > { %v441_v56 = vsel %vm433_vm1, %v439_v51, %v440_v52  ;;  %v443_v57 = vsel %vm433_vm1, %v440_v52, %v442_v15  ;;  %v2223_v58 = vpack.i.bf16 %v463_v55, %v461_v54  ;;  %v375_v9 = vrot.slane %v2233_v61, 1  ;;  %v1867_v55 = vld [vmem:[%s2818_s2 + $0x10] ss:$0 sps:$4 sm:$0x33]  }
  0x2c   : > { %1573 = vrot.lane.b32.xlu1 %v2207_v45, %s2029_s30  ;;  %v1577_v59 = vpack.i.bf16 %v443_v57, %v441_v56  ;;  %v376_v10 = vrot.slane %v2236_v62, 1  ;;  %v378_v13 = vrot.slane %v310_v2, 1  ;;  %v1597_v14 = vpack.i.bf16 %v2246_v4, %v2243_v3  ;;  %1462 = vmatprep.subr.msk.bf16.mxu0 %vm1032_vm2, %v1867_v55 }
  0x2d   : > { %v355_v15 = vrot.slane %v2243_v3, 1  ;;  %v356_v16 = vrot.slane %v2246_v4, 1  ;;  %v358_v17 = vrot.slane %v298_v8, 1  ;;  %v464_v26 = vrot.slane %v2233_v61, 2  ;;  %1463 = vmatprep.subr.msk.bf16.mxu1 %vm1032_vm2, %v1867_v55 }
  0x2e   : > { %1568 = vrot.lane.b32.xlu0 %v1567_v53, %s2029_s30  ;;  %v377_v21 = vsel %vm344_vm0, %v375_v9, %v376_v10  ;;  %v379_v22 = vsel %vm344_vm0, %v376_v10, %v378_v13  ;;  %v465_v27 = vrot.slane %v2236_v62, 2  ;;  %v467_v28 = vrot.slane %v310_v2, 2  ;;  %v1869_v10 = vld [vmem:[%s2818_s2] sm:$0xff]  }
  0x2f   : > { %v357_v23 = vsel %vm344_vm0, %v355_v15, %v356_v16  ;;  %v359_v24 = vsel %vm344_vm0, %v356_v16, %v358_v17  ;;  %v2268_v25 = vpack.i.bf16 %v379_v22, %v377_v21  ;;  %v444_v30 = vrot.slane %v2243_v3, 2 }
  0x30   : > { %1588 = vrot.lane.b32.xlu1 %v2223_v58, %s2029_s30  ;;  %v2274_v29 = vpack.i.bf16 %v359_v24, %v357_v23  ;;  %v445_v31 = vrot.slane %v2246_v4, 2  ;;  %v447_v32 = vrot.slane %v298_v8, 2  ;;  %v466_v33 = vsel %vm433_vm1, %v464_v26, %v465_v27  ;;  %v1868_v8 = vld [vmem:[%s2818_s2 + $0x8] sm:$0xff]  }
  0x31   : > { %v468_v34 = vsel %vm433_vm1, %v465_v27, %v467_v28  ;;  %v2313_v46 = vpack.i.bf16 %v2299_v40, %v2296_v39  ;;  %v380_v48 = vrot.slane %v2296_v39, 1  ;;  %v381_v49 = vrot.slane %v2299_v40, 1 }
  0x32   : > { %1578 = vrot.lane.b32.xlu0 %v1577_v59, %s2029_s30  ;;  %v448_v35 = vsel %vm433_vm1, %v445_v31, %v447_v32  ;;  %v2288_v36 = vpack.i.bf16 %v468_v34, %v466_v33  ;;  %v383_v50 = vrot.slane %v313_v42, 1  ;;  %v2321_v51 = vpack.i.bf16 %v2308_v44, %v2305_v43 }
  0x33   : > { %v360_v52 = vrot.slane %v2305_v43, 1  ;;  %v361_v53 = vrot.slane %v2308_v44, 1  ;;  %v363_v54 = vrot.slane %v301_v47, 1  ;;  %v382_v56 = vsel %vm344_vm0, %v380_v48, %v381_v49 }
  0x34   : > { %1593 = vrot.lane.b32.xlu1 %v2230_v60, %s2030_s5  ;;  %v384_v57 = vsel %vm344_vm0, %v381_v49, %v383_v50  ;;  %v469_v13 = vrot.slane %v2296_v39, 2  ;;  %v472_v15 = vrot.slane %v313_v42, 2  ;;  %v449_v16 = vrot.slane %v2305_v43, 2 }
  0x35   : > { %v364_v2 = vsel %vm344_vm0, %v361_v53, %v363_v54  ;;  %v450_v17 = vrot.slane %v2308_v44, 2  ;;  %v452_v21 = vrot.slane %v301_v47, 2 }
  0x36   : > { %1583 = vrot.lane.b32.xlu0 %v1582_v63, %s2030_s5  ;;  %v362_v63 = vsel %vm344_vm0, %v360_v52, %v361_v53  ;;  %v318_v52 = vld [vmem:[%s2377_s11 + $0x20] sm:$0xff]  ;;  %v319_v53 = vld [vmem:[%s2377_s11 + $0x28] sm:$0x3] }
  0x37   : > { %v1677_v9 = vpack.i.bf16 %v364_v2, %v362_v63  ;;  %v451_v24 = vsel %vm433_vm1, %v449_v16, %v450_v17  ;;  %v453_v26 = vsel %vm433_vm1, %v450_v17, %v452_v21 }
  0x38   : > { %1603 = vrot.lane.b32.xlu1 %v1602_v5, %s2030_s5  ;;  %v1707_v28 = vpack.i.bf16 %v453_v26, %v451_v24 }
  0x3a   : > { %1598 = vrot.lane.b32.xlu0 %v1597_v14, %s2030_s5 }
  0x3c   : > { %1613 = vrot.lane.b32.xlu1 %v2195_v37, %s2031_s6 }
  0x3e   : > { %1608 = vrot.lane.b32.xlu0 %v2179_v20, %s2031_s6  ;;  %v446_v20 = vsel %vm433_vm1, %v444_v30, %v445_v31  ;;  %v316_v30 = vld [vmem:[%s2377_s11 + $0x10] sm:$0x3] }
  0x3f   : > { %v2291_v38 = vpack.i.bf16 %v448_v35, %v446_v20  ;;  %v576_v34 = vrot.slane %v316_v30, 1  ;;  %v1757_v20 = vpack.i.bf16 %v2177_v19, %v2174_v18  ;;  %v629_v47 = vrot.slane %v316_v30, 2 }
  0x40   : > { %1623 = vrot.lane.b32.xlu1 %v2268_v25, %s2031_s6 }
  0x42   : > { %1618 = vrot.lane.b32.xlu0 %v2274_v29, %s2031_s6 }
  0x44   : > { %1633 = vrot.lane.b32.xlu1 %v2223_v58, %s2032_s8 }
  0x46   : > { %1628 = vrot.lane.b32.xlu0 %v1577_v59, %s2032_s8  ;;  %v1034_v59 = vsel %vm1032_vm2, %v1867_v55, 0  ;;  %v731_v55 = vrot.slane %v318_v52, 1 }
  0x47   : > { %1435 = vmatpush3.bf16.msra.mxu0 %v1034_v59  ;;  %1459 = vmatpush3.bf16.msra.mxu1 %v1034_v59 }
  0x48   : > { %1643 = vrot.lane.b32.xlu1 %v2288_v36, %s2032_s8  ;;  %1436 = vmatprep.subr.bf16.mxu0 %v1868_v8 }
  0x49   : > { %1457 = vmatprep.subr.bf16.mxu1 %v1868_v8 }
  0x4a   : > { %1638 = vrot.lane.b32.xlu0 %v2291_v38, %s2032_s8 }
  0x4b   : > { %1437 = vmatpush3.bf16.msra.mxu0 %v1868_v8  ;;  %1460 = vmatpush3.bf16.msra.mxu1 %v1868_v8 }
  0x4c   : > { %1653 = vrot.lane.b32.xlu1 %v1602_v5, %s2033_s9  ;;  %v1682_v5 = vpack.i.bf16 %v384_v57, %v382_v56  ;;  %1438 = vmatprep.subr.bf16.mxu0 %v1869_v10  ;;  %v733_v57 = vrot.slane %v319_v53, 1 }
  0x4d   : > { %1458 = vmatprep.subr.bf16.mxu1 %v1869_v10 }
  0x4e   : > { %1648 = vrot.lane.b32.xlu0 %v1597_v14, %s2033_s9  ;;  %v470_v14 = vrot.slane %v2299_v40, 2  ;;  %v734_v63 = vsel %vm344_vm0, %v731_v55, %v733_v57 }
  0x4f   : > { %1439 = vmatpush3.bf16.msra.mxu0 %v1869_v10  ;;  %1461 = vmatpush3.bf16.msra.mxu1 %v1869_v10 }
  0x50   : > { %1663 = vrot.lane.b32.xlu1 %v2313_v46, %s2033_s9  ;;  %v471_v22 = vsel %vm433_vm1, %v469_v13, %v470_v14  ;;  %v473_v23 = vsel %vm433_vm1, %v470_v14, %v472_v15 }
  0x51   : > { %v1712_v27 = vpack.i.bf16 %v473_v23, %v471_v22 }
  0x52   : > { %1658 = vrot.lane.b32.xlu0 %v2321_v51, %s2033_s9 }
  0x54   : > { %1673 = vrot.lane.b32.xlu1 %v2268_v25, %s2034_s12 }
  0x56   : > { %1668 = vrot.lane.b32.xlu0 %v2274_v29, %s2034_s12 }
  0x58   : > { %1683 = vrot.lane.b32.xlu1 %v1682_v5, %s2034_s12 }
  0x5a   : > { %1678 = vrot.lane.b32.xlu0 %v1677_v9, %s2034_s12 }
  0x5c   : > { %1693 = vrot.lane.b32.xlu1 %v2288_v36, %s2035_s10 }
  0x5e   : > { %1688 = vrot.lane.b32.xlu0 %v2291_v38, %s2035_s10 }
  0x60   : > { %1703 = vrot.lane.b32.xlu1 %v2268_v25, %s2028_s27  ;;  %v314_v25 = vld [vmem:[%s2377_s11] sm:$0xff] }
  0x61   : > { %v573_v32 = vrot.slane %v314_v25, 1  ;;  %v626_v42 = vrot.slane %v314_v25, 2 }
  0x62   : > { %1698 = vrot.lane.b32.xlu0 %v2274_v29, %s2028_s27  ;;  %v315_v29 = vld [vmem:[%s2377_s11 + $0x8] sm:$0xff] }
  0x63   : > { %v1762_v31 = vpack.i.bf16 %v315_v29, %v314_v25  ;;  %v574_v33 = vrot.slane %v315_v29, 1 }
  0x64   : > { %1713 = vrot.lane.b32.xlu1 %v1712_v27, %s2035_s10 }
  0x65   : > { %v575_v35 = vsel %vm344_vm0, %v573_v32, %v574_v33 }
  0x66   : > { %1708 = vrot.lane.b32.xlu0 %v1707_v28, %s2035_s10 }
  0x68   : > { %1723 = vrot.lane.b32.xlu1 %v1682_v5, %s2028_s27 }
  0x6a   : > { %1718 = vrot.lane.b32.xlu0 %v1677_v9, %s2028_s27 }
  0x6c   : > { %1733 = vrot.lane.b32.xlu1 %v2288_v36, %s2029_s30  ;;  %v577_v36 = vsel %vm344_vm0, %v574_v33, %v576_v34 }
  0x6e   : > { %1728 = vrot.lane.b32.xlu0 %v2291_v38, %s2029_s30  ;;  %v1782_v38 = vpack.i.bf16 %v577_v36, %v575_v35 }
  0x70   : > { %1743 = vrot.lane.b32.xlu1 %v1712_v27, %s2029_s30 }
  0x72   : > { %1738 = vrot.lane.b32.xlu0 %v1707_v28, %s2029_s30 }
  0x74   : > { %1753 = vrot.lane.b32.xlu1 %v2313_v46, %s2030_s5  ;;  %v627_v46 = vrot.slane %v315_v29, 2 }
  0x76   : > { %1748 = vrot.lane.b32.xlu0 %v2321_v51, %s2030_s5  ;;  %v628_v48 = vsel %vm433_vm1, %v626_v42, %v627_v46  ;;  %v630_v49 = vsel %vm433_vm1, %v627_v46, %v629_v47  ;;  %v317_v51 = vld [vmem:[%s2377_s11 + $0x18] sm:$0xff] }
  0x77   : > { %v1802_v50 = vpack.i.bf16 %v630_v49, %v628_v48  ;;  %v1822_v54 = vpack.i.bf16 %v318_v52, %v317_v51  ;;  %v730_v56 = vrot.slane %v317_v51, 1  ;;  %v783_v8 = vrot.slane %v317_v51, 2 }
  0x78   : > { %1763 = vrot.lane.b32.xlu1 %v1762_v31, %s2030_s5 }
  0x79   : > { %v732_v59 = vsel %vm344_vm0, %v730_v56, %v731_v55 }
  0x7a   : > { %1758 = vrot.lane.b32.xlu0 %v1757_v20, %s2030_s5  ;;  %v1842_v2 = vpack.i.bf16 %v734_v63, %v732_v59  ;;  %s2036_s5 = smov [#allocation2]  }
  0x7c   : > { %1773 = vrot.lane.b32.xlu1 %v1682_v5, %s2031_s6  ;;  %v784_v5 = vrot.slane %v318_v52, 2 }
  0x7e   : > { %1768 = vrot.lane.b32.xlu0 %v1677_v9, %s2031_s6  ;;  %v786_v9 = vrot.slane %v319_v53, 2  ;;  %v785_v14 = vsel %vm433_vm1, %v783_v8, %v784_v5 }
  0x80   : > { %1783 = vrot.lane.b32.xlu1 %v1782_v38, %s2031_s6  ;;  %v787_v15 = vsel %vm433_vm1, %v784_v5, %v786_v9 }
  0x81   : > { %v1862_v17 = vpack.i.bf16 %v787_v15, %v785_v14 }
  0x82   : > { %1778 = vrot.lane.b32.xlu0 %v2200_v41, %s2031_s6  ;;  %s255_s6 = sand.u32 1, %s2002_s16  }
  0x83   : > { %s2764_s11 = scalar_lea.sflag [#allocation3], %s255_s6 }
  0x84   : > { %1793 = vrot.lane.b32.xlu1 %v1712_v27, %s2032_s8 }
  0x86   : > { %1788 = vrot.lane.b32.xlu0 %v1707_v28, %s2032_s8 }
  0x88   : > { %1803 = vrot.lane.b32.xlu1 %v1802_v50, %s2032_s8 }
  0x8a   : > { %1798 = vrot.lane.b32.xlu0 %v2207_v45, %s2032_s8  ;;  %s1382_s8 = sshll.u32 %s255_s6, 7 }
  0x8c   : > { %1813 = vrot.lane.b32.xlu1 %v1762_v31, %s2033_s9 }
  0x8e   : > { %1808 = vrot.lane.b32.xlu0 %v1757_v20, %s2033_s9 }
  0x90   : > { %1823 = vrot.lane.b32.xlu1 %v1822_v54, %s2033_s9 }
  0x92   : > { %1818 = vrot.lane.b32.xlu0 %v2230_v60, %s2033_s9  ;;  %s2726_s9 = scalar_lea.vmem [#allocation2], %s1382_s8  ;;  %s1938_s8 = sshll.u32 %s2036_s5, 4  ;;  %s1939_s8 = int_to_ptr.vmem [resolvable:$false] %s1938_s8 }
  0x94   : > { %1833 = vrot.lane.b32.xlu1 %v1782_v38, %s2034_s12 }
  0x96   : > { %1828 = vrot.lane.b32.xlu0 %v2200_v41, %s2034_s12  ;;  %v1559_v10 = vpop.permute.xlu1 %1558 }
  0x97   : > { %v1561_v31 = vunpack.i.h.bf16 %v1559_v10  ;;  %v1560_v32 = vunpack.i.l.bf16 %v1559_v10 }
  0x98   : > { %v1549_v13 = vpop.permute.xlu0 %1548  ;;  %1843 = vrot.lane.b32.xlu1 %v1842_v2, %s2034_s12 }
  0x99   : > { %v1551_v33 = vunpack.i.h.bf16 %v1549_v13  ;;  %v1550_v34 = vunpack.i.l.bf16 %v1549_v13  ;;  %v840_v49 = vsel %vm836_vm3, %v2146_v1, %v1561_v31 }
  0x9a   : > { %1838 = vrot.lane.b32.xlu0 %v2195_v37, %s2034_s12  ;;  %v1564_v60 = vpop.permute.xlu1 %1563  ;;  %s1422_s12 = sshll.u32 %s2010_s18, 4 }
  0x9b   : > { %v1566_v38 = vunpack.i.h.bf16 %v1564_v60  ;;  %v1565_v42 = vunpack.i.l.bf16 %v1564_v60  ;;  %v838_v53 = vsel %vm836_vm3, %v2158_v7, %v1551_v33  ;;  %v837_v54 = vsel %vm836_vm3, %v2155_v6, %v1550_v34 }
  0x9c   : > { %v1554_v16 = vpop.permute.xlu0 %1553  ;;  %1853 = vrot.lane.b32.xlu1 %v1802_v50, %s2035_s10  ;;  %v839_v50 = vsel %vm836_vm3, %v2143_v0, %v1560_v32 }
  0x9d   : > { %v1556_v35 = vunpack.i.h.bf16 %v1554_v16  ;;  %v1555_v36 = vunpack.i.l.bf16 %v1554_v16  ;;  %v848_v2 = vsel %vm836_vm3, %v2167_v12, %v1566_v38  ;;  %v847_v7 = vsel %vm836_vm3, %v2164_v11, %v1565_v42 }
  0x9e   : > { %1848 = vrot.lane.b32.xlu0 %v2207_v45, %s2035_s10  ;;  %v1574_v41 = vpop.permute.xlu1 %1573 }
  0x9f   : > { %v1576_v46 = vunpack.i.h.bf16 %v1574_v41  ;;  %v1575_v47 = vunpack.i.l.bf16 %v1574_v41  ;;  %v846_v59 = vsel %vm836_vm3, %v2177_v19, %v1556_v35  ;;  %v845_v1 = vsel %vm836_vm3, %v2174_v18, %v1555_v36 }
  0xa0   : > { %v1569_v21 = vpop.permute.xlu0 %1568  ;;  %1863 = vrot.lane.b32.xlu1 %v1862_v17, %s2035_s10 }
  0xa1   : > { %v1571_v51 = vunpack.i.h.bf16 %v1569_v21  ;;  %v1570_v52 = vunpack.i.l.bf16 %v1569_v21  ;;  %v862_v6 = vsel %vm853_vm4, %v845_v1, %v1575_v47  ;;  %v863_v5 = vsel %vm853_vm4, %v846_v59, %v1576_v46 }
  0xa2   : > { %1858 = vrot.lane.b32.xlu0 %v2223_v58, %s2035_s10  ;;  %v1589_v22 = vpop.permute.xlu1 %1588  ;;  %s1418_s10 = sshll.u32 %s2014_s19, 5  ;;  %s1278_s19 = sshll.u32 %s2726_s9, 4  ;;  %s2758_s19 = int_to_ptr.vmem [resolvable:$true] %s1278_s19 }
  0xa3   : > { %v1591_v55 = vunpack.i.h.bf16 %v1589_v22  ;;  %v1590_v56 = vunpack.i.l.bf16 %v1589_v22  ;;  %v854_v19 = vsel %vm853_vm4, %v837_v54, %v1570_v52  ;;  %v855_v9 = vsel %vm853_vm4, %v838_v53, %v1571_v51  ;;  %s1275_s13 = sadd.s32 %s1422_s12, %s1418_s10  ;;  %s1934_s27 = scalar_lea.vmem %s2758_s19, 2048 }
  0xa4   : > { %v1579_v23 = vpop.permute.xlu0 %1578  ;;  %s1419_s18 = sshll.u32 %s1275_s13, 7  ;;  %p1935_p1 = scmp.ne.s32.totalorder %s2758_s19, %s1934_s27 }
  0xa5   : > { %v1581_v0 = vunpack.i.h.bf16 %v1579_v23  ;;  %v1580_v63 = vunpack.i.l.bf16 %v1579_v23  ;;  %v864_v12 = vsel %vm853_vm4, %v847_v7, %v1590_v56  ;;  %v865_v13 = vsel %vm853_vm4, %v848_v2, %v1591_v55  ;;  %s2755_s24 = scalar_lea.hbm %s2820_s4, %s1419_s18  ;;  %s1940_s12 = scalar_lea.vmem %s1939_s8, 4096 }
  0xa6   : > { %v2430_v24 = vpop.permute.xlu1 %1593  ;;  %p1936_p2 = pnand %p1935_p1, %p2114_p3  ;;  %p1941_p5 = scmp.lt.s32.totalorder %s2758_s19, %s1939_s8 }
  0xa7   : > { %v1596_v18 = vunpack.i.h.bf16 %v2430_v24  ;;  %v1595_v10 = vunpack.i.l.bf16 %v2430_v24  ;;  %v857_v60 = vsel %vm853_vm4, %v840_v49, %v1581_v0  ;;  %v856_v16 = vsel %vm853_vm4, %v839_v50, %v1580_v63  ;;  %p1942_p6 = scmp.lt.s32.totalorder %s1940_s12, %s1934_s27 }
  0xa8   : > { %v2432_v37 = vpop.permute.xlu0 %1583  ;;  %p1937_p4 = pneg %p1936_p2 }
  0xa9   : > { %v1586_v11 = vunpack.i.h.bf16 %v2432_v37  ;;  %v1585_v14 = vunpack.i.l.bf16 %v2432_v37  ;;  %v879_v31 = vsel %vm870_vm5, %v862_v6, %v1595_v10  ;;  %v880_v32 = vsel %vm870_vm5, %v863_v5, %v1596_v18  ;;  %p1943_p7 = por %p1942_p6, %p1941_p5 }
  0xaa   : > { %v2434_v26 = vpop.permute.xlu1 %1603 }
  0xab   : > { %v1606_v17 = vunpack.i.h.bf16 %v2434_v26  ;;  %v1605_v41 = vunpack.i.l.bf16 %v2434_v26  ;;  %v871_v26 = vsel %vm870_vm5, %v854_v19, %v1585_v14  ;;  %p1944_p9 = pnand %p1943_p7, %p1937_p4 }
  0xac   : > { %v2436_v27 = vpop.permute.xlu0 %1598 }
  0xad   : > { %v1601_v21 = vunpack.i.h.bf16 %v2436_v27  ;;  %v1600_v22 = vunpack.i.l.bf16 %v2436_v27  ;;  %v872_v27 = vsel %vm870_vm5, %v855_v9, %v1586_v11  ;;  %v881_v38 = vsel %vm870_vm5, %v864_v12, %v1605_v41 }
  0xae   : > { %v2438_v28 = vpop.permute.xlu1 %1613  ;;  %v882_v42 = vsel %vm870_vm5, %v865_v13, %v1606_v17 }
  0xaf   : > { %v1616_v23 = vunpack.i.h.bf16 %v2438_v28  ;;  %v1615_v24 = vunpack.i.l.bf16 %v2438_v28  ;;  %v874_v49 = vsel %vm870_vm5, %v857_v60, %v1601_v21 }
  0xb0   : > { %v2440_v45 = vpop.permute.xlu0 %1608 }
  0xb1   : > { %v1611_v33 = vunpack.i.h.bf16 %v2440_v45  ;;  %v1610_v34 = vunpack.i.l.bf16 %v2440_v45  ;;  %v873_v45 = vsel %vm870_vm5, %v856_v16, %v1600_v22  ;;  %v896_v50 = vsel %vm887_vm6, %v879_v31, %v1615_v24 }
  0xb2   : > { %v2442_v25 = vpop.permute.xlu1 %1623  ;;  %v897_v51 = vsel %vm887_vm6, %v880_v32, %v1616_v23 }
  0xb3   : > { %v1626_v35 = vunpack.i.h.bf16 %v2442_v25  ;;  %v1625_v28 = vunpack.i.l.bf16 %v2442_v25  ;;  %v888_v25 = vsel %vm887_vm6, %v871_v26, %v1610_v34  ;;  %v889_v53 = vsel %vm887_vm6, %v872_v27, %v1611_v33 }
  0xb4   : > { %v2444_v29 = vpop.permute.xlu0 %1618 }
  0xb5   : > { %v899_v56 = vsel %vm887_vm6, %v882_v42, %v1626_v35  ;;  %v1621_v59 = vunpack.i.h.bf16 %v2444_v29  ;;  %v1620_v1 = vunpack.i.l.bf16 %v2444_v29 }
  0xb6   : > { %v2446_v30 = vpop.permute.xlu1 %1633 }
  0xb7   : > { %v1636_v46 = vunpack.i.h.bf16 %v2446_v30  ;;  %v1635_v47 = vunpack.i.l.bf16 %v2446_v30  ;;  %v898_v30 = vsel %vm887_vm6, %v881_v38, %v1625_v28 }
  0xb8   : > { %v2448_v58 = vpop.permute.xlu0 %1628 }
  0xb9   : > { %v1631_v54 = vunpack.i.h.bf16 %v2448_v58  ;;  %v1630_v55 = vunpack.i.l.bf16 %v2448_v58  ;;  %v913_v63 = vsel %vm904_vm7, %v896_v50, %v1635_v47  ;;  %v914_v2 = vsel %vm904_vm7, %v897_v51, %v1636_v46 }
  0xba   : > { %v2450_v20 = vpop.permute.xlu1 %1643 }
  0xbb   : > { %v905_v29 = vsel %vm904_vm7, %v888_v25, %v1630_v55  ;;  %v906_v10 = vsel %vm904_vm7, %v889_v53, %v1631_v54  ;;  %v1646_v12 = vunpack.i.h.bf16 %v2450_v20  ;;  %v1645_v13 = vunpack.i.l.bf16 %v2450_v20 }
  0xbc   : > { %v2452_v48 = vpop.permute.xlu0 %1638  ;;  %v890_v54 = vsel %vm887_vm6, %v873_v45, %v1620_v1 }
  0xbd   : > { %v1641_v11 = vunpack.i.h.bf16 %v2452_v48  ;;  %v915_v55 = vsel %vm904_vm7, %v898_v30, %v1645_v13 }
  0xbe   : > { %v2462_v57 = vpop.permute.xlu1 %1653 }
  0xbf   : > { %v1656_v7 = vunpack.i.h.bf16 %v2462_v57  ;;  %v1655_v6 = vunpack.i.l.bf16 %v2462_v57  ;;  %v1640_v57 = vunpack.i.l.bf16 %v2452_v48 }
  0xc0   : > { %v2474_v8 = vpop.permute.xlu0 %1648 }
  0xc1   : > { %v1651_v58 = vunpack.i.h.bf16 %v2474_v8  ;;  %v1650_v5 = vunpack.i.l.bf16 %v2474_v8  ;;  %v930_v8 = vsel %vm921_vm8, %v913_v63, %v1655_v6  ;;  %v931_v17 = vsel %vm921_vm8, %v914_v2, %v1656_v7 }
  0xc2   : > { %v2484_v15 = vpop.permute.xlu1 %1663  ;;  %v916_v63 = vsel %vm904_vm7, %v899_v56, %v1646_v12  ;;  %v907_v2 = vsel %vm904_vm7, %v890_v54, %v1640_v57 }
  0xc3   : > { %v922_v22 = vsel %vm921_vm8, %v905_v29, %v1650_v5  ;;  %v923_v23 = vsel %vm921_vm8, %v906_v10, %v1651_v58  ;;  %v1666_v26 = vunpack.i.h.bf16 %v2484_v15  ;;  %v1665_v38 = vunpack.i.l.bf16 %v2484_v15 }
  0xc4   : > { %v2494_v37 = vpop.permute.xlu0 %1658  ;;  %v891_v15 = vsel %vm887_vm6, %v874_v49, %v1621_v59 }
  0xc5   : > { %v1661_v42 = vunpack.i.h.bf16 %v2494_v37  ;;  %v1660_v50 = vunpack.i.l.bf16 %v2494_v37  ;;  %v908_v37 = vsel %vm904_vm7, %v891_v15, %v1641_v11  ;;  %v932_v58 = vsel %vm921_vm8, %v915_v55, %v1665_v38 }
  0xc6   : > { %v1674_v36 = vpop.permute.xlu1 %1673  ;;  %v933_v45 = vsel %vm921_vm8, %v916_v63, %v1666_v26 }
  0xc7   : > { %v1676_v19 = vunpack.i.h.bf16 %v1674_v36  ;;  %v1675_v9 = vunpack.i.l.bf16 %v1674_v36  ;;  %v924_v30 = vsel %vm921_vm8, %v907_v2, %v1660_v50  ;;  %v925_v56 = vsel %vm921_vm8, %v908_v37, %v1661_v42 }
  0xc8   : > { %v1669_v52 = vpop.permute.xlu0 %1668 }
  0xc9   : > { %v1671_v14 = vunpack.i.h.bf16 %v1669_v52  ;;  %v1670_v60 = vunpack.i.l.bf16 %v1669_v52  ;;  %v947_v20 = vsel %vm938_vm9, %v930_v8, %v1675_v9  ;;  %v948_v31 = vsel %vm938_vm9, %v931_v17, %v1676_v19 }
  0xca   : > { %v2520_v0 = vpop.permute.xlu1 %1683 }
  0xcb   : > { %v939_v35 = vsel %vm938_vm9, %v922_v22, %v1670_v60  ;;  %v940_v28 = vsel %vm938_vm9, %v923_v23, %v1671_v14  ;;  %v1686_v51 = vunpack.i.h.bf16 %v2520_v0  ;;  %v1685_v52 = vunpack.i.l.bf16 %v2520_v0 }
  0xcc   : > { %v2528_v18 = vpop.permute.xlu0 %1678 }
  0xcd   : > { %v1681_v7 = vunpack.i.h.bf16 %v2528_v18  ;;  %v1680_v0 = vunpack.i.l.bf16 %v2528_v18  ;;  %v949_v1 = vsel %vm938_vm9, %v932_v58, %v1685_v52  ;;  %v950_v5 = vsel %vm938_vm9, %v933_v45, %v1686_v51 }
  0xce   : > { %v1694_v16 = vpop.permute.xlu1 %1693 }
  0xcf   : > { %v1696_v41 = vunpack.i.h.bf16 %v1694_v16  ;;  %v1695_v21 = vunpack.i.l.bf16 %v1694_v16  ;;  %v941_v12 = vsel %vm938_vm9, %v924_v30, %v1680_v0  ;;  %v942_v13 = vsel %vm938_vm9, %v925_v56, %v1681_v7 }
  0xd0   : > { %v1689_v24 = vpop.permute.xlu0 %1688 }
  0xd1   : > { %v1691_v32 = vunpack.i.h.bf16 %v1689_v24  ;;  %v1690_v48 = vunpack.i.l.bf16 %v1689_v24  ;;  %v964_v33 = vsel %vm955_vm10, %v947_v20, %v1695_v21  ;;  %v965_v34 = vsel %vm955_vm10, %v948_v31, %v1696_v41 }
  0xd2   : > { %v2545_v27 = vpop.permute.xlu1 %1703  ;;  %v976_v36 = vpack.c.bf16 %v965_v34, %v964_v33 }
  0xd3   : > { %v956_v46 = vsel %vm955_vm10, %v939_v35, %v1690_v48  ;;  %v957_v47 = vsel %vm955_vm10, %v940_v28, %v1691_v32  ;;  %v1706_v34 = vunpack.i.h.bf16 %v2545_v27  ;;  %v1705_v26 = vunpack.i.l.bf16 %v2545_v27 }
  0xd4   : > { %v2556_v25 = vpop.permute.xlu0 %1698  ;;  %v972_v53 = vpack.c.bf16 %v957_v47, %v956_v46  ;;  %1448 = vmatprep.mubr.msk.bf16.mxu1 %vm1007_vm11, %v976_v36 }
  0xd5   : > { %v1701_v28 = vunpack.i.h.bf16 %v2556_v25  ;;  %v1700_v36 = vunpack.i.l.bf16 %v2556_v25  ;;  %v850_v47 = vsel %vm836_vm3, %v2236_v62, %v1706_v34  ;;  %v849_v50 = vsel %vm836_vm3, %v2233_v61, %v1705_v26 }
  0xd6   : > { %1440 = vmatprep.mubr.msk.bf16.mxu0 %vm1007_vm11, %v972_v53  ;;  %v1714_v6 = vpop.permute.xlu1 %1713 }
  0xd7   : > { %v1716_v49 = vunpack.i.h.bf16 %v1714_v6  ;;  %v1715_v59 = vunpack.i.l.bf16 %v1714_v6  ;;  %v842_v25 = vsel %vm836_vm3, %v2246_v4, %v1701_v28  ;;  %v841_v63 = vsel %vm836_vm3, %v2243_v3, %v1700_v36 }
  0xd8   : > { %v1709_v19 = vpop.permute.xlu0 %1708 }
  0xd9   : > { %v966_v9 = vsel %vm955_vm10, %v949_v1, %v1715_v59  ;;  %v967_v18 = vsel %vm955_vm10, %v950_v5, %v1716_v49  ;;  %v1711_v29 = vunpack.i.h.bf16 %v1709_v19  ;;  %v1710_v10 = vunpack.i.l.bf16 %v1709_v19 }
  0xda   : > { %v977_v11 = vpack.c.bf16 %v967_v18, %v966_v9  ;;  %v1724_v57 = vpop.permute.xlu1 %1723 }
  0xdb   : > { %v958_v14 = vsel %vm955_vm10, %v941_v12, %v1710_v10  ;;  %v959_v60 = vsel %vm955_vm10, %v942_v13, %v1711_v29  ;;  %v1726_v42 = vunpack.i.h.bf16 %v1724_v57  ;;  %v1725_v46 = vunpack.i.l.bf16 %v1724_v57 }
  0xdc   : > { %v973_v16 = vpack.c.bf16 %v959_v60, %v958_v14  ;;  %v1719_v8 = vpop.permute.xlu0 %1718  ;;  %1449 = vmatmul.mubr.msk.bf16.vlgmr.msra.gmra.mxu1 %vm1007_vm11, %v977_v11 }
  0xdd   : > { %v1721_v51 = vunpack.i.h.bf16 %v1719_v8  ;;  %v1720_v52 = vunpack.i.l.bf16 %v1719_v8  ;;  %v852_v61 = vsel %vm836_vm3, %v2299_v40, %v1726_v42  ;;  %v851_v7 = vsel %vm836_vm3, %v2296_v39, %v1725_v46 }
  0xde   : > { %1441 = vmatmul.mubr.msk.bf16.vlgmr.msra.gmra.mxu0 %vm1007_vm11, %v973_v16  ;;  %v1734_v17 = vpop.permute.xlu1 %1733 }
  0xdf   : > { %v1736_v27 = vunpack.i.h.bf16 %v1734_v17  ;;  %v1735_v54 = vunpack.i.l.bf16 %v1734_v17  ;;  %v844_v58 = vsel %vm836_vm3, %v2308_v44, %v1721_v51  ;;  %v843_v4 = vsel %vm836_vm3, %v2305_v43, %v1720_v52 }
  0xe0   : > { %v1729_v41 = vpop.permute.xlu0 %1728 }
  0xe1   : > { %v1731_v15 = vunpack.i.h.bf16 %v1729_v41  ;;  %v1730_v55 = vunpack.i.l.bf16 %v1729_v41  ;;  %v866_v59 = vsel %vm853_vm4, %v849_v50, %v1735_v54  ;;  %v867_v30 = vsel %vm853_vm4, %v850_v47, %v1736_v27 }
  0xe2   : > { %v1744_v21 = vpop.permute.xlu1 %1743 }
  0xe3   : > { %v1746_v2 = vunpack.i.h.bf16 %v1744_v21  ;;  %v1745_v37 = vunpack.i.l.bf16 %v1744_v21  ;;  %v858_v40 = vsel %vm853_vm4, %v841_v63, %v1730_v55  ;;  %v859_v39 = vsel %vm853_vm4, %v842_v25, %v1731_v15 }
  0xe4   : > { %v1739_v22 = vpop.permute.xlu0 %1738 }
  0xe5   : > { %v1741_v0 = vunpack.i.h.bf16 %v1739_v22  ;;  %v1740_v6 = vunpack.i.l.bf16 %v1739_v22  ;;  %v868_v56 = vsel %vm853_vm4, %v851_v7, %v1745_v37  ;;  %v869_v1 = vsel %vm853_vm4, %v852_v61, %v1746_v2 }
  0xe6   : > { %v1754_v23 = vpop.permute.xlu1 %1753 }
  0xe7   : > { %v1756_v45 = vunpack.i.h.bf16 %v1754_v23  ;;  %v1755_v3 = vunpack.i.l.bf16 %v1754_v23  ;;  %v860_v43 = vsel %vm853_vm4, %v843_v4, %v1740_v6  ;;  %v861_v9 = vsel %vm853_vm4, %v844_v58, %v1741_v0 }
  0xe8   : > { %v1749_v24 = vpop.permute.xlu0 %1748 }
  0xe9   : > { %v1751_v44 = vunpack.i.h.bf16 %v1749_v24  ;;  %v1750_v5 = vunpack.i.l.bf16 %v1749_v24  ;;  %v883_v10 = vsel %vm870_vm5, %v866_v59, %v1755_v3  ;;  %v884_v12 = vsel %vm870_vm5, %v867_v30, %v1756_v45 }
  0xea   : > { %v2582_v20 = vpop.permute.xlu1 %1763 }
  0xeb   : > { %v1766_v18 = vunpack.i.h.bf16 %v2582_v20  ;;  %v1765_v29 = vunpack.i.l.bf16 %v2582_v20  ;;  %v875_v17 = vsel %vm870_vm5, %v858_v40, %v1750_v5  ;;  %v876_v41 = vsel %vm870_vm5, %v859_v39, %v1751_v44 }
  0xec   : > { %v2584_v31 = vpop.permute.xlu0 %1758 }
  0xed   : > { %v1761_v13 = vunpack.i.h.bf16 %v2584_v31  ;;  %v1760_v11 = vunpack.i.l.bf16 %v2584_v31  ;;  %v885_v24 = vsel %vm870_vm5, %v868_v56, %v1765_v29  ;;  %v886_v20 = vsel %vm870_vm5, %v869_v1, %v1766_v18 }
  0xee   : > { %v2586_v32 = vpop.permute.xlu1 %1773 }
  0xef   : > { %v1776_v14 = vunpack.i.h.bf16 %v2586_v32  ;;  %v1775_v60 = vunpack.i.l.bf16 %v2586_v32  ;;  %v877_v34 = vsel %vm870_vm5, %v860_v43, %v1760_v11 }
  0xf0   : > { %v2588_v48 = vpop.permute.xlu0 %1768 }
  0xf1   : > { %v1771_v16 = vunpack.i.h.bf16 %v2588_v48  ;;  %v1770_v8 = vunpack.i.l.bf16 %v2588_v48  ;;  %v878_v48 = vsel %vm870_vm5, %v861_v9, %v1761_v13  ;;  %v901_v42 = vsel %vm887_vm6, %v884_v12, %v1776_v14 }
  0xf2   : > { %v2590_v33 = vpop.permute.xlu1 %1783 }
  0xf3   : > { %v1786_v21 = vunpack.i.h.bf16 %v2590_v33  ;;  %v1785_v22 = vunpack.i.l.bf16 %v2590_v33  ;;  %v900_v33 = vsel %vm887_vm6, %v883_v10, %v1775_v60  ;;  %v892_v46 = vsel %vm887_vm6, %v875_v17, %v1770_v8 }
  0xf4   : > { %v2594_v35 = vpop.permute.xlu0 %1778  ;;  %v893_v47 = vsel %vm887_vm6, %v876_v41, %v1771_v16 }
  0xf5   : > { %v1781_v31 = vunpack.i.h.bf16 %v2594_v35  ;;  %v1780_v32 = vunpack.i.l.bf16 %v2594_v35  ;;  %v902_v35 = vsel %vm887_vm6, %v885_v24, %v1785_v22  ;;  %v903_v50 = vsel %vm887_vm6, %v886_v20, %v1786_v21 }
  0xf6   : > { %v2598_v38 = vpop.permute.xlu1 %1793 }
  0xf7   : > { %v1796_v26 = vunpack.i.h.bf16 %v2598_v38  ;;  %v1795_v28 = vunpack.i.l.bf16 %v2598_v38  ;;  %v894_v38 = vsel %vm887_vm6, %v877_v34, %v1780_v32  ;;  %v895_v54 = vsel %vm887_vm6, %v878_v48, %v1781_v31 }
  0xf8   : > { %v2604_v53 = vpop.permute.xlu0 %1788 }
  0xf9   : > { %v1791_v51 = vunpack.i.h.bf16 %v2604_v53  ;;  %v1790_v52 = vunpack.i.l.bf16 %v2604_v53  ;;  %v917_v25 = vsel %vm904_vm7, %v900_v33, %v1795_v28  ;;  %v918_v63 = vsel %vm904_vm7, %v901_v42, %v1796_v26 }
  0xfa   : > { %v2610_v62 = vpop.permute.xlu1 %1803 }
  0xfb   : > { %v1806_v15 = vunpack.i.h.bf16 %v2610_v62  ;;  %v1805_v55 = vunpack.i.l.bf16 %v2610_v62  ;;  %v909_v58 = vsel %vm904_vm7, %v892_v46, %v1790_v52  ;;  %v910_v4 = vsel %vm904_vm7, %v893_v47, %v1791_v51 }
  0xfc   : > { %v2620_v49 = vpop.permute.xlu0 %1798 }
  0xfd   : > { %v1801_v2 = vunpack.i.h.bf16 %v2620_v49  ;;  %v1800_v37 = vunpack.i.l.bf16 %v2620_v49  ;;  %v919_v59 = vsel %vm904_vm7, %v902_v35, %v1805_v55  ;;  %v920_v30 = vsel %vm904_vm7, %v903_v50, %v1806_v15 }
  0xfe   : > { %v2628_v19 = vpop.permute.xlu1 %1813 }
  0xff   : > { %v1816_v53 = vunpack.i.h.bf16 %v2628_v19  ;;  %v1815_v7 = vunpack.i.l.bf16 %v2628_v19  ;;  %v911_v39 = vsel %vm904_vm7, %v894_v38, %v1800_v37  ;;  %v912_v56 = vsel %vm904_vm7, %v895_v54, %v1801_v2 }
 0x100   : > { %v1809_v57 = vpop.permute.xlu0 %1808 }
 0x101   : > { %v1811_v0 = vunpack.i.h.bf16 %v1809_v57  ;;  %v1810_v6 = vunpack.i.l.bf16 %v1809_v57  ;;  %v934_v19 = vsel %vm921_vm8, %v917_v25, %v1815_v7  ;;  %v935_v43 = vsel %vm921_vm8, %v918_v63, %v1816_v53  ;;  %v2713_v53 = vld [vmem:[%s2819_s3] ss:$0 sm:$0xff] }
 0x102   : > { %v1824_v23 = vpop.permute.xlu1 %1823 }
 0x103   : > { %v1826_v62 = vunpack.i.h.bf16 %v1824_v23  ;;  %v1825_v45 = vunpack.i.l.bf16 %v1824_v23  ;;  %v926_v9 = vsel %vm921_vm8, %v909_v58, %v1810_v6  ;;  %v927_v18 = vsel %vm921_vm8, %v910_v4, %v1811_v0 }
 0x104   : > { %v2654_v36 = vpop.permute.xlu0 %1818 }
 0x105   : > { %v1820_v49 = vunpack.i.l.bf16 %v2654_v36  ;;  %v936_v29 = vsel %vm921_vm8, %v919_v59, %v1825_v45  ;;  %v937_v10 = vsel %vm921_vm8, %v920_v30, %v1826_v62  ;;  %v1821_v12 = vunpack.i.h.bf16 %v2654_v36 }
 0x106   : > { %v1834_v27 = vpop.permute.xlu1 %1833 }
 0x107   : > { %v1835_v40 = vunpack.i.l.bf16 %v1834_v27  ;;  %v1836_v1 = vunpack.i.h.bf16 %v1834_v27  ;;  %v928_v57 = vsel %vm921_vm8, %v911_v39, %v1820_v49  ;;  %v929_v47 = vsel %vm921_vm8, %v912_v56, %v1821_v12 }
 0x108   : > { %v1829_v61 = vpop.permute.xlu0 %1828 }
 0x109   : > { %v1830_v44 = vunpack.i.l.bf16 %v1829_v61  ;;  %v1831_v13 = vunpack.i.h.bf16 %v1829_v61  ;;  %v951_v14 = vsel %vm938_vm9, %v934_v19, %v1835_v40  ;;  %v952_v8 = vsel %vm938_vm9, %v935_v43, %v1836_v1 }
 0x10a   : > { %v1844_v3 = vpop.permute.xlu1 %1843 }
 0x10b   : > { %v943_v17 = vsel %vm938_vm9, %v926_v9, %v1830_v44  ;;  %v1846_v41 = vunpack.i.h.bf16 %v1844_v3  ;;  %v1845_v21 = vunpack.i.l.bf16 %v1844_v3  ;;  %v944_v32 = vsel %vm938_vm9, %v927_v18, %v1831_v13 }
 0x10c   : > { %v1839_v5 = vpop.permute.xlu0 %1838 }
 0x10d   : > { %v1841_v34 = vunpack.i.h.bf16 %v1839_v5  ;;  %v1840_v48 = vunpack.i.l.bf16 %v1839_v5  ;;  %v953_v35 = vsel %vm938_vm9, %v936_v29, %v1845_v21  ;;  %v954_v50 = vsel %vm938_vm9, %v937_v10, %v1846_v41 }
 0x10e   : > { %v1854_v11 = vpop.permute.xlu1 %1853 }
 0x10f   : > { %v1856_v60 = vunpack.i.h.bf16 %v1854_v11  ;;  %v1855_v16 = vunpack.i.l.bf16 %v1854_v11  ;;  %v945_v55 = vsel %vm938_vm9, %v928_v57, %v1840_v48  ;;  %v946_v25 = vsel %vm938_vm9, %v929_v47, %v1841_v34 }
 0x110   : > { %v1849_v22 = vpop.permute.xlu0 %1848 }
 0x111   : > { %v968_v23 = vsel %vm955_vm10, %v951_v14, %v1855_v16  ;;  %v969_v24 = vsel %vm955_vm10, %v952_v8, %v1856_v60  ;;  %v1851_v20 = vunpack.i.h.bf16 %v1849_v22  ;;  %v1850_v31 = vunpack.i.l.bf16 %v1849_v22 }
 0x112   : > { %v978_v26 = vpack.c.bf16 %v969_v24, %v968_v23  ;;  %v1864_v28 = vpop.permute.xlu1 %1863 }
 0x113   : > { %v960_v36 = vsel %vm955_vm10, %v943_v17, %v1850_v31  ;;  %v961_v33 = vsel %vm955_vm10, %v944_v32, %v1851_v20  ;;  %v1866_v42 = vunpack.i.h.bf16 %v1864_v28  ;;  %v1865_v46 = vunpack.i.l.bf16 %v1864_v28 }
 0x114   : > { %v974_v51 = vpack.c.bf16 %v961_v33, %v960_v36  ;;  %v1859_v52 = vpop.permute.xlu0 %1858  ;;  %1452 = vmatprep.mubr.msk.bf16.mxu1 %vm1007_vm11, %v978_v26 }
 0x115   : > { %v970_v27 = vsel %vm955_vm10, %v953_v35, %v1865_v46  ;;  %v971_v38 = vsel %vm955_vm10, %v954_v50, %v1866_v42  ;;  %v1861_v54 = vunpack.i.h.bf16 %v1859_v52  ;;  %v1860_v15 = vunpack.i.l.bf16 %v1859_v52 }
 0x116   : > { %v979_v63 = vpack.c.bf16 %v971_v38, %v970_v27  ;;  %1444 = vmatprep.mubr.msk.bf16.mxu0 %vm1007_vm11, %v974_v51 }
 0x117   : > { %v962_v2 = vsel %vm955_vm10, %v945_v55, %v1860_v15  ;;  %v963_v37 = vsel %vm955_vm10, %v946_v25, %v1861_v54 }
 0x118   : > { %v975_v61 = vpack.c.bf16 %v963_v37, %v962_v2  ;;  %1453 = vmatmul.mubr.msk.bf16.gmra.mxu1 %vm1007_vm11, %v979_v63 }
 0x11a   : > { %1445 = vmatmul.mubr.msk.bf16.gmra.mxu0 %vm1007_vm11, %v975_v61 }
 0x19c   : > { %v1450_v7 = vpop.f32.mrf.mxu1 }
 0x19d   : > { %v1111_v0 = vadd.f32 %v1450_v7, %v2713_v53 }
 0x19e   : > { %v1442_v6 = vpop.f32.mrf.mxu0  ;;  %v1102_v58 = vpop.f32.mrf.mxu1 }
 0x19f   : > { %v1079_v4 = vadd.f32 %v1442_v6, %v2713_v53  ;;  %v1409_v62 = vmul.f32 -1.442695, %v1111_v0  ;;  %v1103_v45 = vadd.f32 %v2713_v53, %v1102_v58 }
 0x1a0   : > { %v1070_v3 = vpop.f32.mrf.mxu0  ;;  %v1451_v59 = vpop.f32.mrf.mxu1 }
 0x1a1   : > { %v1401_v30 = vmul.f32 -1.442695, %v1079_v4  ;;  %1870 = vpow2.f32 %v1409_v62  ;;  %v1071_v49 = vadd.f32 %v2713_v53, %v1070_v3  ;;  %v1407_v40 = vmul.f32 -1.442695, %v1103_v45 }
 0x1a2   : > { %v1443_v39 = vpop.f32.mrf.mxu0  ;;  %v1114_v56 = vadd.f32 %v1451_v59, %v2713_v53  ;;  %v1105_v1 = vpop.f32.mrf.mxu1 }
 0x1a3   : > { %1872 = vpow2.f32 %v1401_v30  ;;  %v1399_v44 = vmul.f32 -1.442695, %v1071_v49  ;;  %v1082_v5 = vadd.f32 %v1443_v39, %v2713_v53  ;;  %v1106_v19 = vadd.f32 %v2713_v53, %v1105_v1 }
 0x1a4   : > { %1874 = vpow2.f32 %v1407_v40  ;;  %v1410_v43 = vmul.f32 -1.442695, %v1114_v56  ;;  %v1073_v9 = vpop.f32.mrf.mxu0 }
 0x1a5   : > { %1876 = vpow2.f32 %v1399_v44  ;;  %v1402_v18 = vmul.f32 -1.442695, %v1082_v5  ;;  %v1074_v29 = vadd.f32 %v2713_v53, %v1073_v9  ;;  %v1408_v10 = vmul.f32 -1.442695, %v1106_v19 }
 0x1a6   : > { %1878 = vpow2.f32 %v1410_v43 }
 0x1a7   : > { %1880 = vpow2.f32 %v1402_v18  ;;  %v1400_v12 = vmul.f32 -1.442695, %v1074_v29 }
 0x1a8   : > { %1882 = vpow2.f32 %v1408_v10 }
 0x1a9   : > { %1884 = vpow2.f32 %v1400_v12 }
 0x1ae   : > { %v1871_v13 = vpop.eup %1870 }
 0x1af   : > { %v1191_v11 = vadd.f32 1.0, %v1871_v13 }
 0x1b0   : > { %v1873_v57 = vpop.eup %1872 }
 0x1b1   : > { %v1875_v14 = vpop.eup %1874  ;;  %v1183_v60 = vadd.f32 1.0, %v1873_v57  ;;  %1886 = vrcp.f32 %v1191_v11 }
 0x1b2   : > { %v1877_v16 = vpop.eup %1876  ;;  %v1189_v8 = vadd.f32 1.0, %v1875_v14 }
 0x1b3   : > { %v1879_v17 = vpop.eup %1878  ;;  %1888 = vrcp.f32 %v1183_v60  ;;  %v1181_v41 = vadd.f32 1.0, %v1877_v16 }
 0x1b4   : > { %v1881_v21 = vpop.eup %1880  ;;  %1890 = vrcp.f32 %v1189_v8  ;;  %v1192_v22 = vadd.f32 1.0, %v1879_v17 }
 0x1b5   : > { %v1883_v23 = vpop.eup %1882  ;;  %1892 = vrcp.f32 %v1181_v41  ;;  %v1184_v24 = vadd.f32 1.0, %v1881_v21 }
 0x1b6   : > { %v1885_v20 = vpop.eup %1884  ;;  %1894 = vrcp.f32 %v1192_v22  ;;  %v1190_v31 = vadd.f32 1.0, %v1883_v23 }
 0x1b7   : > { %1896 = vrcp.f32 %v1184_v24  ;;  %v1182_v32 = vadd.f32 1.0, %v1885_v20 }
 0x1b8   : > { %1898 = vrcp.f32 %v1190_v31 }
 0x1b9   : > { %1900 = vrcp.f32 %v1182_v32 }
 0x1be   : > { %v1887_v34 = vpop.eup %1886 }
 0x1bf   : > { %v1239_v48 = vmul.f32 %v1887_v34, %v1111_v0 }
 0x1c0   : > { %v1889_v26 = vpop.eup %1888 }
 0x1c1   : > { %v1891_v28 = vpop.eup %1890  ;;  %v1231_v36 = vmul.f32 %v1889_v26, %v1079_v4  ;;  %1255 = vst [vmem:[%s2726_s9 + $0x50] sm:$0xff] %v1239_v48 }
 0x1c2   : > { %v1893_v33 = vpop.eup %1892  ;;  %v1237_v42 = vmul.f32 %v1891_v28, %v1103_v45 }
 0x1c3   : > { %v1895_v46 = vpop.eup %1894  ;;  %1247 = vst [vmem:[%s2726_s9 + $0x10] sm:$0xff] %v1231_v36  ;;  %v1229_v47 = vmul.f32 %v1893_v33, %v1071_v49 }
 0x1c4   : > { %v1897_v35 = vpop.eup %1896  ;;  %1253 = vst [vmem:[%s2726_s9 + $0x40] sm:$0xff] %v1237_v42  ;;  %v1240_v50 = vmul.f32 %v1895_v46, %v1114_v56 }
 0x1c5   : > { %v1899_v51 = vpop.eup %1898  ;;  %1245 = vst [vmem:[%s2726_s9] sm:$0xff] %v1229_v47  ;;  %v1232_v52 = vmul.f32 %v1897_v35, %v1082_v5 }
 0x1c6   : > { %v1901_v27 = vpop.eup %1900  ;;  %1256 = vst [vmem:[%s2726_s9 + $0x58] sm:$0xff] %v1240_v50  ;;  %v1238_v38 = vmul.f32 %v1899_v51, %v1106_v19 }
 0x1c7   : > { %1248 = vst [vmem:[%s2726_s9 + $0x18] sm:$0xff] %v1232_v52  ;;  %v1230_v54 = vmul.f32 %v1901_v27, %v1074_v29 }
 0x1c8   : > { %1254 = vst [vmem:[%s2726_s9 + $0x48] sm:$0xff] %v1238_v38 }
 0x1c9   : > { %1246 = vst [vmem:[%s2726_s9 + $0x8] sm:$0xff] %v1230_v54 }
 0x1d8   : > { %v1454_v15 = vpop.f32.mrf.mxu1 }
 0x1d9   : > { %v1127_v55 = vadd.f32 %v1454_v15, %v2713_v53 }
 0x1da   : > { %v1446_v25 = vpop.f32.mrf.mxu0  ;;  %v1118_v63 = vpop.f32.mrf.mxu1 }
 0x1db   : > { %v1095_v2 = vadd.f32 %v1446_v25, %v2713_v53  ;;  %v1413_v37 = vmul.f32 -1.442695, %v1127_v55  ;;  %v1119_v61 = vadd.f32 %v2713_v53, %v1118_v63 }
 0x1dc   : > { %v1086_v7 = vpop.f32.mrf.mxu0  ;;  %v1455_v0 = vpop.f32.mrf.mxu1 }
 0x1dd   : > { %v1405_v6 = vmul.f32 -1.442695, %v1095_v2  ;;  %1902 = vpow2.f32 %v1413_v37  ;;  %v1087_v58 = vadd.f32 %v2713_v53, %v1086_v7  ;;  %v1411_v4 = vmul.f32 -1.442695, %v1119_v61 }
 0x1de   : > { %v1447_v62 = vpop.f32.mrf.mxu0  ;;  %v1130_v45 = vadd.f32 %v1455_v0, %v2713_v53  ;;  %v1121_v3 = vpop.f32.mrf.mxu1 }
 0x1df   : > { %1904 = vpow2.f32 %v1405_v6  ;;  %v1403_v59 = vmul.f32 -1.442695, %v1087_v58  ;;  %v1098_v30 = vadd.f32 %v1447_v62, %v2713_v53  ;;  %v1122_v49 = vadd.f32 %v2713_v53, %v1121_v3 }
 0x1e0   : > { %1906 = vpow2.f32 %v1411_v4  ;;  %v1414_v40 = vmul.f32 -1.442695, %v1130_v45  ;;  %v1089_v39 = vpop.f32.mrf.mxu0 }
 0x1e1   : > { %1908 = vpow2.f32 %v1403_v59  ;;  %v1406_v56 = vmul.f32 -1.442695, %v1098_v30  ;;  %v1090_v1 = vadd.f32 %v2713_v53, %v1089_v39  ;;  %v1412_v44 = vmul.f32 -1.442695, %v1122_v49 }
 0x1e2   : > { %1910 = vpow2.f32 %v1414_v40 }
 0x1e3   : > { %1912 = vpow2.f32 %v1406_v56  ;;  %v1404_v5 = vmul.f32 -1.442695, %v1090_v1 }
 0x1e4   : > { %1914 = vpow2.f32 %v1412_v44 }
 0x1e5   : > { %1916 = vpow2.f32 %v1404_v5 }
 0x1ea   : > { %v1903_v19 = vpop.eup %1902 }
 0x1eb   : > { %v1195_v43 = vadd.f32 1.0, %v1903_v19 }
 0x1ec   : > { %v1905_v9 = vpop.eup %1904 }
 0x1ed   : > { %v1907_v18 = vpop.eup %1906  ;;  %v1187_v29 = vadd.f32 1.0, %v1905_v9  ;;  %1918 = vrcp.f32 %v1195_v43 }
 0x1ee   : > { %v1909_v10 = vpop.eup %1908  ;;  %v1193_v12 = vadd.f32 1.0, %v1907_v18 }
 0x1ef   : > { %v1911_v13 = vpop.eup %1910  ;;  %1920 = vrcp.f32 %v1187_v29  ;;  %v1185_v11 = vadd.f32 1.0, %v1909_v10 }
 0x1f0   : > { %v1913_v53 = vpop.eup %1912  ;;  %1922 = vrcp.f32 %v1193_v12  ;;  %v1196_v57 = vadd.f32 1.0, %v1911_v13 }
 0x1f1   : > { %v1915_v14 = vpop.eup %1914  ;;  %1924 = vrcp.f32 %v1185_v11  ;;  %v1188_v60 = vadd.f32 1.0, %v1913_v53 }
 0x1f2   : > { %v1917_v16 = vpop.eup %1916  ;;  %1926 = vrcp.f32 %v1196_v57  ;;  %v1194_v8 = vadd.f32 1.0, %v1915_v14 }
 0x1f3   : > { %1928 = vrcp.f32 %v1188_v60  ;;  %v1186_v17 = vadd.f32 1.0, %v1917_v16 }
 0x1f4   : > { %1930 = vrcp.f32 %v1194_v8 }
 0x1f5   : > { %1932 = vrcp.f32 %v1186_v17 }
 0x1fa   : > { %v1919_v41 = vpop.eup %1918 }
 0x1fb   : > { %v1243_v21 = vmul.f32 %v1919_v41, %v1127_v55 }
 0x1fc   : > { %v1921_v22 = vpop.eup %1920 }
 0x1fd   : > { %v1923_v23 = vpop.eup %1922  ;;  %v1235_v24 = vmul.f32 %v1921_v22, %v1095_v2  ;;  %1259 = vst [vmem:[%s2726_s9 + $0x70] sm:$0xff] %v1243_v21 }
 0x1fe   : > { %v1925_v20 = vpop.eup %1924  ;;  %v1241_v31 = vmul.f32 %v1923_v23, %v1119_v61 }
 0x1ff   : > { %v1927_v32 = vpop.eup %1926  ;;  %1251 = vst [vmem:[%s2726_s9 + $0x30] sm:$0xff] %v1235_v24  ;;  %v1233_v34 = vmul.f32 %v1925_v20, %v1087_v58 }
 0x200   : > { %v1929_v48 = vpop.eup %1928  ;;  %1257 = vst [vmem:[%s2726_s9 + $0x60] sm:$0xff] %v1241_v31  ;;  %v1244_v26 = vmul.f32 %v1927_v32, %v1130_v45 }
 0x201   : > { %v1931_v28 = vpop.eup %1930  ;;  %1249 = vst [vmem:[%s2726_s9 + $0x20] sm:$0xff] %v1233_v34  ;;  %v1236_v36 = vmul.f32 %v1929_v48, %v1098_v30 }
 0x202   : > { %v1933_v33 = vpop.eup %1932  ;;  %1260 = vst [vmem:[%s2726_s9 + $0x78] sm:$0xff] %v1244_v26  ;;  %v1242_v42 = vmul.f32 %v1931_v28, %v1122_v49 }
 0x203   : > { %1252 = vst [vmem:[%s2726_s9 + $0x38] sm:$0xff] %v1236_v36  ;;  %v1234_v46 = vmul.f32 %v1933_v33, %v1090_v1 }
 0x204   : > { %1258 = vst [vmem:[%s2726_s9 + $0x68] sm:$0xff] %v1242_v42 }
 0x205   : > { %1250 = vst [vmem:[%s2726_s9 + $0x28] sm:$0xff] %v1234_v46 }
 0x206   : > { %1947 = shalt.err (!%p1944_p9)
}
 0x207   : > { %s1948_s6 = scalar_lea.hbm %s2755_s24, 2048  ;;  %s1952_s13 = scalar_lea.hbm %s2820_s4, 8192 }
 0x208   : > { %p1949_p10 = scmp.ne.s32.totalorder %s2755_s24, %s1948_s6  ;;  %p1953_p13 = scmp.lt.s32.totalorder %s2755_s24, %s2820_s4 }
 0x209   : > { %p1954_p0 = scmp.lt.s32.totalorder %s1952_s13, %s1948_s6 }
 0x20a   : > { %p1950_p11 = pnand %p1949_p10, %p2114_p3 }
 0x20b   : > { %p1955_p1 = por %p1954_p0, %p1953_p13 }
 0x20c   : > { %p1951_p12 = pneg %p1950_p11 }
 0x20e   : > { %p1956_p2 = pnand %p1955_p1, %p1951_p12 }
 0x210   : > { %1959 = shalt.err (!%p1956_p2)
}
 0x211   : > { %s2037_s23 = smov 128  }
 0x212   : > { %1467 = dma.vmem_to_hbm [thread:$0]  (%p2114_p3), %s2758_s19, 2048, %s2755_s24, %s2764_s11, %s2037_s23, %s2037_s23, %s2029_s30  }
 0x213 PF: > { %p1473_p4 = scmp.ge.s32.totalorder %s2026_s22, 2  ;;  %s1293_s27 = sand.u32 1, %s1998_s15  }
 0x214   : > { %s1294_s5 = scalar_lea.sflag [#allocation3], %s1293_s27 }
 0x215   : > { %p1470_p5 = pnand %p1473_p4, %p2123_p8 }
 0x217   : > { %p1471_p6 = pneg %p1470_p5 }
 0x219   : > { %1993 = dma.done.wait (%p1471_p6), %s1294_s5, 2048  }
 0x21a   : > { %1995 = vsyncadd (%p1471_p6), %s1294_s5, 4294965248  ;;  %s17_s22 = sadd.s32 1, %s2026_s22   ;;  %s2823_s15 = smov %s2002_s16 }
 0x21b   : > { %p14_p7 = scmp.ge.s32.totalorder %s17_s22, 6   ;;  %s2824_s16 = smov %s2006_s17 }
 0x21c   : > { %s2825_s17 = smov %s2132_s7  ;;  %s2826_s18 = smov %s2018_s20 }
 0x21d   : > { %s2827_s19 = smov %s2022_s21  ;;  %s2828_s20 = smov %s2831_s25 }
 0x21e   : > { %s2829_s21 = smov %s2835_s26  ;;  %16 = sbr.rel (!%p14_p7) target bundleno = 5 (0x5), region = 74 }
 0x223   :  { %1299 = vsyncpa [#allocation3], 1 }
 0x224   :  { %1301 = vsyncpa [#allocation3 + $0x1], 1 }

</bundles_post_ra>
